<compile_context>
chip_gen: v5e
topology: v5e:2x2
jax: 0.10.0
libtpu: 0.0.40
codegen_flags: <defaults>
</compile_context>

<pallas_src>
import functools

import jax
import jax.numpy as jnp
from jax import lax
from jax.experimental import pallas as pl
from jax.experimental.pallas import tpu as pltpu


def _round_up(n, m):
    return -(-n // m) * m


def _hornn_kernel(
    # streamed per-chunk inputs
    inp_ref,      # (T, b_pad, hid_pad)  pre-projected input: u_t @ W_in.T + b_in
    noise_ref,    # (T, b_pad, hid_pad)  noise_std * noise_t
    # resident inputs
    x0_ref,       # (b_pad, hid_pad)
    p_ref,        # (hid_pad, r1 + 2*r2)  [N_rnn | M_tbrnn | N_tbrnn]
    qt_ref,       # (r1 + r2, hid_pad)    [M_rnn.T/hid ; L_tbrnn.T/hid**2]
    # outputs
    traj_ref,     # (T, b_pad, hid_pad)
    # scratch
    x_state,      # (b_pad, hid_pad) f32 -- carries x across time chunks
    *, r1, r2, tau, steps,
):
    @pl.when(pl.program_id(0) == 0)
    def _():
        x_state[...] = x0_ref[...]

    p = p_ref[...]      # hoisted loads (constant across the inner loop)
    qt = qt_ref[...]

    def step(t, x):
        r = jnp.tanh(x)                                        # form == 'rate'
        rp = jnp.dot(r, p, preferred_element_type=jnp.float32)  # (b, r1+2*r2)
        r_n = rp[:, :r1]
        r_m = rp[:, r1:r1 + r2]
        r_nt = rp[:, r1 + r2:]
        cat = jnp.concatenate([r_n, r_m * r_nt], axis=-1)       # (b, r1+r2)
        rec_x = jnp.dot(cat, qt, preferred_element_type=jnp.float32) + inp_ref[t]
        # mode == 'cont' Euler update with injected (pre-scaled) noise
        x_new = x + noise_ref[t] + tau * (rec_x - x)
        traj_ref[t] = x_new
        return x_new

    x_state[...] = lax.fori_loop(0, steps, step, x_state[...], unroll=True)


@functools.partial(jax.jit, static_argnames=("noise_std", "tau", "time_block"))
def hornn_forward_pallas(u, x0, noise, params, *, noise_std=0.05, tau=0.2,
                         time_block=32):
    """u: (b, seq, in); x0: (b, hid); noise: (seq, b, hid)."""
    b, seq, in_dim = u.shape
    hid = params["W_in"].shape[0]
    r1 = params["M_rnn"].shape[1]
    r2 = params["L_tbrnn"].shape[1]

    # --- padding / chunking choices --------------------------------------
    b_pad = _round_up(b, 8)          # sublane multiple
    hid_pad = _round_up(hid, 128)    # lane multiple -> unmasked traj stores
    T = min(seq, time_block)         # inner (unrolled) steps per grid step
    n_chunks = -(-seq // T)
    seq_pad = n_chunks * T

    # --- hoisted input projection (full-MXU batched matmul) --------------
    # (seq, b, hid) time-major
    inp = jnp.einsum("bsi,hi->sbh", u, params["W_in"]) + params["b_in"]
    noise_s = noise_std * noise                                  # fold noise_std

    pad3 = lambda a: jnp.pad(
        a, ((0, seq_pad - seq), (0, b_pad - b), (0, hid_pad - hid)))
    inp_p = pad3(inp)
    noise_p = pad3(noise_s)
    x0_p = jnp.pad(x0, ((0, b_pad - b), (0, hid_pad - hid)))

    # --- fused, pre-transposed, pre-scaled low-rank weights --------------
    P = jnp.concatenate(
        [params["N_rnn"], params["M_tbrnn"], params["N_tbrnn"]], axis=1)
    P = jnp.pad(P, ((0, hid_pad - hid), (0, 0)))                 # (hid_pad, r1+2*r2)
    Qt = jnp.concatenate(
        [params["M_rnn"].T / hid, params["L_tbrnn"].T / (hid ** 2)], axis=0)
    Qt = jnp.pad(Qt, ((0, 0), (0, hid_pad - hid)))               # (r1+r2, hid_pad)

    per_chunk = lambda: pl.BlockSpec((T, b_pad, hid_pad), lambda c: (c, 0, 0))
    full2d = lambda shp: pl.BlockSpec(shp, lambda c: (0, 0))

    kernel = functools.partial(_hornn_kernel, r1=r1, r2=r2, tau=tau, steps=T)

    traj_tm_p = pl.pallas_call(
        kernel,
        out_shape=jax.ShapeDtypeStruct((seq_pad, b_pad, hid_pad), jnp.float32),
        grid_spec=pltpu.PrefetchScalarGridSpec(
            num_scalar_prefetch=0,
            grid=(n_chunks,),
            in_specs=[
                per_chunk(),                 # pre-projected input (time-chunked)
                per_chunk(),                 # pre-scaled noise    (time-chunked)
                full2d((b_pad, hid_pad)),    # x0
                full2d(P.shape),             # fused forward low-rank weights
                full2d(Qt.shape),            # fused (scaled) back-projection
            ],
            out_specs=per_chunk(),           # trajectories (lane-dense slab)
            scratch_shapes=[pltpu.VMEM((b_pad, hid_pad), jnp.float32)],
        ),
        compiler_params=pltpu.CompilerParams(
            dimension_semantics=("arbitrary",),   # sequential recurrence over time
        ),
    )(inp_p, noise_p, x0_p, P, Qt)

    # --- un-pad, hoisted output projection --------------------------------
    traj_tm = traj_tm_p[:seq, :b, :hid]                    # (seq, b, hid)
    trajectories = jnp.transpose(traj_tm, (1, 0, 2))       # (b, seq, hid)
    x_final = traj_tm[seq - 1]                             # (b, hid)
    output = jnp.tanh(trajectories) @ params["W_out"].T + params["b_out"]
    return output, x_final, trajectories


def hornn_forward_ref(u, x0, noise, params, *, noise_std=0.05, tau=0.2):
    """Pure-JAX reference replicating the PyTorch forward (same noise)."""
    hid = params["W_in"].shape[0]

    def step(x, inputs):
        u_t, n_t = inputs
        r = jnp.tanh(x)
        input_i = u_t @ params["W_in"].T + params["b_in"]
        h_rnn = (r @ params["N_rnn"]) @ params["M_rnn"].T / hid
        h_tb = ((r @ params["M_tbrnn"]) * (r @ params["N_tbrnn"])) \
            @ params["L_tbrnn"].T / (hid ** 2)
        rec_x = h_rnn + h_tb + input_i
        x_new = x + noise_std * n_t + tau * (-x + rec_x)
        return x_new, x_new

    u_tm = jnp.transpose(u, (1, 0, 2))
    x_final, traj_tm = jax.lax.scan(step, x0, (u_tm, noise))
    trajectories = jnp.transpose(traj_tm, (1, 0, 2))
    output = jnp.tanh(trajectories) @ params["W_out"].T + params["b_out"]
    return output, x_final, trajectories


def make_params(key, input_size, output_size, hidden_dim, rank_rnn, rank_tbrnn):
    ks = jax.random.split(key, 8)

    def xavier(k, shape):
        fan_in, fan_out = shape[0], shape[1]
        bound = jnp.sqrt(6.0 / (fan_in + fan_out))
        return jax.random.uniform(k, shape, jnp.float32, -bound, bound)

    return {
        "M_rnn": xavier(ks[0], (hidden_dim, rank_rnn)),
        "N_rnn": xavier(ks[1], (hidden_dim, rank_rnn)),
        "L_tbrnn": xavier(ks[2], (hidden_dim, rank_tbrnn)),
        "M_tbrnn": xavier(ks[3], (hidden_dim, rank_tbrnn)),
        "N_tbrnn": xavier(ks[4], (hidden_dim, rank_tbrnn)),
        "W_in": jax.random.normal(ks[5], (hidden_dim, input_size), jnp.float32),
        "b_in": jnp.zeros((1, hidden_dim), jnp.float32),
        "W_out": 4.0 * jax.random.normal(ks[6], (output_size, hidden_dim),
                                         jnp.float32),
        "b_out": 0.1 * jax.random.normal(ks[7], (1, output_size), jnp.float32),
    }


if __name__ == "__main__":
    batch, seq, input_size, output_size, hidden_dim = 2, 8, 4, 3, 32
    rank_rnn, rank_tbrnn = 2, 2
    noise_std, tau = 0.05, 0.2

    key = jax.random.PRNGKey(0)
    k_u, k_x0, k_noise, k_params = jax.random.split(key, 4)

    u = jax.random.normal(k_u, (batch, seq, input_size), jnp.float32)
    x0 = 0.1 * jax.random.normal(k_x0, (batch, hidden_dim), jnp.float32)
    # Noise is sampled outside the kernel (deterministic for this test) and
    # injected exactly as `noise_std * noise[t]` in the state update.
    noise = jax.random.normal(k_noise, (seq, batch, hidden_dim), jnp.float32)
    params = make_params(k_params, input_size, output_size, hidden_dim,
                         rank_rnn, rank_tbrnn)

    out, x_fin, traj = hornn_forward_pallas(
        u, x0, noise, params, noise_std=noise_std, tau=tau)
    jax.block_until_ready((out, x_fin, traj))

    out_r, x_fin_r, traj_r = hornn_forward_ref(
        u, x0, noise, params, noise_std=noise_std, tau=tau)

    assert out.shape == (batch, seq, output_size)
    assert x_fin.shape == (batch, hidden_dim)
    assert traj.shape == (batch, seq, hidden_dim)
    assert jnp.allclose(traj, traj_r, rtol=1e-4, atol=1e-4)
    assert jnp.allclose(x_fin, x_fin_r, rtol=1e-4, atol=1e-4)
    assert jnp.allclose(out, out_r, rtol=1e-4, atol=1e-4)

    print("KERNEL_OK")
</pallas_src>

<mosaic_0001>
module attributes {stable_mosaic.version = 11 : i64} {
  func.func @_hornn_kernel(%arg0: i32, %arg1: memref<8x8x128xf32, #tpu.memory_space<vmem>>, %arg2: memref<8x8x128xf32, #tpu.memory_space<vmem>>, %arg3: memref<8x128xf32, #tpu.memory_space<vmem>>, %arg4: memref<128x6xf32, #tpu.memory_space<vmem>>, %arg5: memref<4x128xf32, #tpu.memory_space<vmem>>, %arg6: memref<8x8x128xf32, #tpu.memory_space<vmem>>, %arg7: memref<8x128xf32, #tpu.memory_space<vmem>>) attributes {dimension_semantics = [#tpu.dimension_semantics<arbitrary>], iteration_bounds = array<i64: 1>, scalar_prefetch = 0 : i64, scratch_operands = 1 : i64, tpu.core_type = #tpu.core_type<tc>, window_params = [{transform_indices = @transform_0, window_bounds = array<i64: 8, 8, 128>}, {transform_indices = @transform_1, window_bounds = array<i64: 8, 8, 128>}, {pipeline_mode = #tpu.pipeline_mode<synchronous>, transform_indices = @transform_2, window_bounds = array<i64: 8, 128>}, {pipeline_mode = #tpu.pipeline_mode<synchronous>, transform_indices = @transform_3, window_bounds = array<i64: 128, 6>}, {pipeline_mode = #tpu.pipeline_mode<synchronous>, transform_indices = @transform_4, window_bounds = array<i64: 4, 128>}, {transform_indices = @transform_5, window_bounds = array<i64: 8, 8, 128>}]} {
    %c0_i32 = arith.constant 0 : i32
    %0 = arith.cmpi eq, %arg0, %c0_i32 : i32
    %1 = arith.extui %0 : i1 to i32
    %c0_i32_0 = arith.constant 0 : i32
    %2 = arith.cmpi ne, %1, %c0_i32_0 : i32
    scf.if %2 {
      %c0_80 = arith.constant 0 : index
      %c0_81 = arith.constant 0 : index
      %199 = vector.load %arg3[%c0_80, %c0_81] : memref<8x128xf32, #tpu.memory_space<vmem>>, vector<8x128xf32>
      %c0_82 = arith.constant 0 : index
      %c0_83 = arith.constant 0 : index
      %200 = vector.load %arg7[%c0_82, %c0_83] : memref<8x128xf32, #tpu.memory_space<vmem>>, vector<8x128xf32>
      tpu.vector_store %arg7[%c0_82, %c0_83], %199 {strides = array<i32>} : memref<8x128xf32, #tpu.memory_space<vmem>>, vector<8x128xf32>,
    } else {
    }
    %c0 = arith.constant 0 : index
    %c0_1 = arith.constant 0 : index
    %3 = vector.load %arg4[%c0, %c0_1] : memref<128x6xf32, #tpu.memory_space<vmem>>, vector<128x6xf32>
    %c0_2 = arith.constant 0 : index
    %c0_3 = arith.constant 0 : index
    %4 = vector.load %arg5[%c0_2, %c0_3] : memref<4x128xf32, #tpu.memory_space<vmem>>, vector<4x128xf32>
    %c0_4 = arith.constant 0 : index
    %c0_5 = arith.constant 0 : index
    %5 = vector.load %arg7[%c0_4, %c0_5] : memref<8x128xf32, #tpu.memory_space<vmem>>, vector<8x128xf32>
    %c0_i32_6 = arith.constant 0 : i32
    %6 = math.tanh %5 : vector<8x128xf32>
    %cst = arith.constant dense<0.000000e+00> : vector<8x6xf32>
    %7 = tpu.matmul %6, %3, %cst {dimension_numbers = #tpu.dot_dimension_numbers<[1], [0], [0], [1], [0, 0, 1, 1], [], []>} : vector<8x128xf32>, vector<128x6xf32>, vector<8x6xf32> -> vector<8x6xf32>
    %8 = vector.extract_strided_slice %7 {offsets = [0, 0], sizes = [8, 2], strides = [1, 1]} : vector<8x6xf32> to vector<8x2xf32>
    %9 = vector.extract_strided_slice %7 {offsets = [0, 2], sizes = [8, 2], strides = [1, 1]} : vector<8x6xf32> to vector<8x2xf32>
    %10 = vector.extract_strided_slice %7 {offsets = [0, 4], sizes = [8, 2], strides = [1, 1]} : vector<8x6xf32> to vector<8x2xf32>
    %11 = arith.mulf %9, %10 : vector<8x2xf32>
    %12 = tpu.concatenate %8, %11 in 1 : vector<8x2xf32>, vector<8x2xf32> -> vector<8x4xf32>
    %cst_7 = arith.constant dense<0.000000e+00> : vector<8x128xf32>
    %13 = tpu.matmul %12, %4, %cst_7 {dimension_numbers = #tpu.dot_dimension_numbers<[1], [0], [0], [1], [0, 0, 1, 1], [], []>} : vector<8x4xf32>, vector<4x128xf32>, vector<8x128xf32> -> vector<8x128xf32>
    %14 = arith.index_cast %c0_i32_6 : i32 to index
    %c0_8 = arith.constant 0 : index
    %c0_9 = arith.constant 0 : index
    %15 = vector.load %arg1[%14, %c0_8, %c0_9] : memref<8x8x128xf32, #tpu.memory_space<vmem>>, vector<1x8x128xf32>
    %16 = vector.shape_cast %15 : vector<1x8x128xf32> to vector<8x128xf32>
    %17 = arith.addf %13, %16 : vector<8x128xf32>
    %18 = arith.index_cast %c0_i32_6 : i32 to index
    %c0_10 = arith.constant 0 : index
    %c0_11 = arith.constant 0 : index
    %19 = vector.load %arg2[%18, %c0_10, %c0_11] : memref<8x8x128xf32, #tpu.memory_space<vmem>>, vector<1x8x128xf32>
    %20 = vector.shape_cast %19 : vector<1x8x128xf32> to vector<8x128xf32>
    %21 = arith.addf %5, %20 : vector<8x128xf32>
    %22 = arith.subf %17, %5 : vector<8x128xf32>
    %cst_12 = arith.constant 2.000000e-01 : f32
    %23 = vector.broadcast %cst_12 : f32 to vector<8x128xf32>
    %24 = arith.mulf %23, %22 : vector<8x128xf32>
    %25 = arith.addf %21, %24 : vector<8x128xf32>
    %26 = arith.index_cast %c0_i32_6 : i32 to index
    %c0_13 = arith.constant 0 : index
    %c0_14 = arith.constant 0 : index
    %27 = vector.load %arg6[%26, %c0_13, %c0_14] : memref<8x8x128xf32, #tpu.memory_space<vmem>>, vector<1x8x128xf32>
    %28 = vector.shape_cast %27 : vector<1x8x128xf32> to vector<8x128xf32>
    %29 = vector.shape_cast %25 : vector<8x128xf32> to vector<1x8x128xf32>
    tpu.vector_store %arg6[%26, %c0_13, %c0_14], %29 {strides = array<i32>} : memref<8x8x128xf32, #tpu.memory_space<vmem>>, vector<1x8x128xf32>,
    %c1_i32 = arith.constant 1 : i32
    %30 = math.tanh %25 : vector<8x128xf32>
    %cst_15 = arith.constant dense<0.000000e+00> : vector<8x6xf32>
    %31 = tpu.matmul %30, %3, %cst_15 {dimension_numbers = #tpu.dot_dimension_numbers<[1], [0], [0], [1], [0, 0, 1, 1], [], []>} : vector<8x128xf32>, vector<128x6xf32>, vector<8x6xf32> -> vector<8x6xf32>
    %32 = vector.extract_strided_slice %31 {offsets = [0, 0], sizes = [8, 2], strides = [1, 1]} : vector<8x6xf32> to vector<8x2xf32>
    %33 = vector.extract_strided_slice %31 {offsets = [0, 2], sizes = [8, 2], strides = [1, 1]} : vector<8x6xf32> to vector<8x2xf32>
    %34 = vector.extract_strided_slice %31 {offsets = [0, 4], sizes = [8, 2], strides = [1, 1]} : vector<8x6xf32> to vector<8x2xf32>
    %35 = arith.mulf %33, %34 : vector<8x2xf32>
    %36 = tpu.concatenate %32, %35 in 1 : vector<8x2xf32>, vector<8x2xf32> -> vector<8x4xf32>
    %cst_16 = arith.constant dense<0.000000e+00> : vector<8x128xf32>
    %37 = tpu.matmul %36, %4, %cst_16 {dimension_numbers = #tpu.dot_dimension_numbers<[1], [0], [0], [1], [0, 0, 1, 1], [], []>} : vector<8x4xf32>, vector<4x128xf32>, vector<8x128xf32> -> vector<8x128xf32>
    %38 = arith.index_cast %c1_i32 : i32 to index
    %c0_17 = arith.constant 0 : index
    %c0_18 = arith.constant 0 : index
    %39 = vector.load %arg1[%38, %c0_17, %c0_18] : memref<8x8x128xf32, #tpu.memory_space<vmem>>, vector<1x8x128xf32>
    %40 = vector.shape_cast %39 : vector<1x8x128xf32> to vector<8x128xf32>
    %41 = arith.addf %37, %40 : vector<8x128xf32>
    %42 = arith.index_cast %c1_i32 : i32 to index
    %c0_19 = arith.constant 0 : index
    %c0_20 = arith.constant 0 : index
    %43 = vector.load %arg2[%42, %c0_19, %c0_20] : memref<8x8x128xf32, #tpu.memory_space<vmem>>, vector<1x8x128xf32>
    %44 = vector.shape_cast %43 : vector<1x8x128xf32> to vector<8x128xf32>
    %45 = arith.addf %25, %44 : vector<8x128xf32>
    %46 = arith.subf %41, %25 : vector<8x128xf32>
    %cst_21 = arith.constant 2.000000e-01 : f32
    %47 = vector.broadcast %cst_21 : f32 to vector<8x128xf32>
    %48 = arith.mulf %47, %46 : vector<8x128xf32>
    %49 = arith.addf %45, %48 : vector<8x128xf32>
    %50 = arith.index_cast %c1_i32 : i32 to index
    %c0_22 = arith.constant 0 : index
    %c0_23 = arith.constant 0 : index
    %51 = vector.load %arg6[%50, %c0_22, %c0_23] : memref<8x8x128xf32, #tpu.memory_space<vmem>>, vector<1x8x128xf32>
    %52 = vector.shape_cast %51 : vector<1x8x128xf32> to vector<8x128xf32>
    %53 = vector.shape_cast %49 : vector<8x128xf32> to vector<1x8x128xf32>
    tpu.vector_store %arg6[%50, %c0_22, %c0_23], %53 {strides = array<i32>} : memref<8x8x128xf32, #tpu.memory_space<vmem>>, vector<1x8x128xf32>,
    %c2_i32 = arith.constant 2 : i32
    %54 = math.tanh %49 : vector<8x128xf32>
    %cst_24 = arith.constant dense<0.000000e+00> : vector<8x6xf32>
    %55 = tpu.matmul %54, %3, %cst_24 {dimension_numbers = #tpu.dot_dimension_numbers<[1], [0], [0], [1], [0, 0, 1, 1], [], []>} : vector<8x128xf32>, vector<128x6xf32>, vector<8x6xf32> -> vector<8x6xf32>
    %56 = vector.extract_strided_slice %55 {offsets = [0, 0], sizes = [8, 2], strides = [1, 1]} : vector<8x6xf32> to vector<8x2xf32>
    %57 = vector.extract_strided_slice %55 {offsets = [0, 2], sizes = [8, 2], strides = [1, 1]} : vector<8x6xf32> to vector<8x2xf32>
    %58 = vector.extract_strided_slice %55 {offsets = [0, 4], sizes = [8, 2], strides = [1, 1]} : vector<8x6xf32> to vector<8x2xf32>
    %59 = arith.mulf %57, %58 : vector<8x2xf32>
    %60 = tpu.concatenate %56, %59 in 1 : vector<8x2xf32>, vector<8x2xf32> -> vector<8x4xf32>
    %cst_25 = arith.constant dense<0.000000e+00> : vector<8x128xf32>
    %61 = tpu.matmul %60, %4, %cst_25 {dimension_numbers = #tpu.dot_dimension_numbers<[1], [0], [0], [1], [0, 0, 1, 1], [], []>} : vector<8x4xf32>, vector<4x128xf32>, vector<8x128xf32> -> vector<8x128xf32>
    %62 = arith.index_cast %c2_i32 : i32 to index
    %c0_26 = arith.constant 0 : index
    %c0_27 = arith.constant 0 : index
    %63 = vector.load %arg1[%62, %c0_26, %c0_27] : memref<8x8x128xf32, #tpu.memory_space<vmem>>, vector<1x8x128xf32>
    %64 = vector.shape_cast %63 : vector<1x8x128xf32> to vector<8x128xf32>
    %65 = arith.addf %61, %64 : vector<8x128xf32>
    %66 = arith.index_cast %c2_i32 : i32 to index
    %c0_28 = arith.constant 0 : index
    %c0_29 = arith.constant 0 : index
    %67 = vector.load %arg2[%66, %c0_28, %c0_29] : memref<8x8x128xf32, #tpu.memory_space<vmem>>, vector<1x8x128xf32>
    %68 = vector.shape_cast %67 : vector<1x8x128xf32> to vector<8x128xf32>
    %69 = arith.addf %49, %68 : vector<8x128xf32>
    %70 = arith.subf %65, %49 : vector<8x128xf32>
    %cst_30 = arith.constant 2.000000e-01 : f32
    %71 = vector.broadcast %cst_30 : f32 to vector<8x128xf32>
    %72 = arith.mulf %71, %70 : vector<8x128xf32>
    %73 = arith.addf %69, %72 : vector<8x128xf32>
    %74 = arith.index_cast %c2_i32 : i32 to index
    %c0_31 = arith.constant 0 : index
    %c0_32 = arith.constant 0 : index
    %75 = vector.load %arg6[%74, %c0_31, %c0_32] : memref<8x8x128xf32, #tpu.memory_space<vmem>>, vector<1x8x128xf32>
    %76 = vector.shape_cast %75 : vector<1x8x128xf32> to vector<8x128xf32>
    %77 = vector.shape_cast %73 : vector<8x128xf32> to vector<1x8x128xf32>
    tpu.vector_store %arg6[%74, %c0_31, %c0_32], %77 {strides = array<i32>} : memref<8x8x128xf32, #tpu.memory_space<vmem>>, vector<1x8x128xf32>,
    %c3_i32 = arith.constant 3 : i32
    %78 = math.tanh %73 : vector<8x128xf32>
    %cst_33 = arith.constant dense<0.000000e+00> : vector<8x6xf32>
    %79 = tpu.matmul %78, %3, %cst_33 {dimension_numbers = #tpu.dot_dimension_numbers<[1], [0], [0], [1], [0, 0, 1, 1], [], []>} : vector<8x128xf32>, vector<128x6xf32>, vector<8x6xf32> -> vector<8x6xf32>
    %80 = vector.extract_strided_slice %79 {offsets = [0, 0], sizes = [8, 2], strides = [1, 1]} : vector<8x6xf32> to vector<8x2xf32>
    %81 = vector.extract_strided_slice %79 {offsets = [0, 2], sizes = [8, 2], strides = [1, 1]} : vector<8x6xf32> to vector<8x2xf32>
    %82 = vector.extract_strided_slice %79 {offsets = [0, 4], sizes = [8, 2], strides = [1, 1]} : vector<8x6xf32> to vector<8x2xf32>
    %83 = arith.mulf %81, %82 : vector<8x2xf32>
    %84 = tpu.concatenate %80, %83 in 1 : vector<8x2xf32>, vector<8x2xf32> -> vector<8x4xf32>
    %cst_34 = arith.constant dense<0.000000e+00> : vector<8x128xf32>
    %85 = tpu.matmul %84, %4, %cst_34 {dimension_numbers = #tpu.dot_dimension_numbers<[1], [0], [0], [1], [0, 0, 1, 1], [], []>} : vector<8x4xf32>, vector<4x128xf32>, vector<8x128xf32> -> vector<8x128xf32>
    %86 = arith.index_cast %c3_i32 : i32 to index
    %c0_35 = arith.constant 0 : index
    %c0_36 = arith.constant 0 : index
    %87 = vector.load %arg1[%86, %c0_35, %c0_36] : memref<8x8x128xf32, #tpu.memory_space<vmem>>, vector<1x8x128xf32>
    %88 = vector.shape_cast %87 : vector<1x8x128xf32> to vector<8x128xf32>
    %89 = arith.addf %85, %88 : vector<8x128xf32>
    %90 = arith.index_cast %c3_i32 : i32 to index
    %c0_37 = arith.constant 0 : index
    %c0_38 = arith.constant 0 : index
    %91 = vector.load %arg2[%90, %c0_37, %c0_38] : memref<8x8x128xf32, #tpu.memory_space<vmem>>, vector<1x8x128xf32>
    %92 = vector.shape_cast %91 : vector<1x8x128xf32> to vector<8x128xf32>
    %93 = arith.addf %73, %92 : vector<8x128xf32>
    %94 = arith.subf %89, %73 : vector<8x128xf32>
    %cst_39 = arith.constant 2.000000e-01 : f32
    %95 = vector.broadcast %cst_39 : f32 to vector<8x128xf32>
    %96 = arith.mulf %95, %94 : vector<8x128xf32>
    %97 = arith.addf %93, %96 : vector<8x128xf32>
    %98 = arith.index_cast %c3_i32 : i32 to index
    %c0_40 = arith.constant 0 : index
    %c0_41 = arith.constant 0 : index
    %99 = vector.load %arg6[%98, %c0_40, %c0_41] : memref<8x8x128xf32, #tpu.memory_space<vmem>>, vector<1x8x128xf32>
    %100 = vector.shape_cast %99 : vector<1x8x128xf32> to vector<8x128xf32>
    %101 = vector.shape_cast %97 : vector<8x128xf32> to vector<1x8x128xf32>
    tpu.vector_store %arg6[%98, %c0_40, %c0_41], %101 {strides = array<i32>} : memref<8x8x128xf32, #tpu.memory_space<vmem>>, vector<1x8x128xf32>,
    %c4_i32 = arith.constant 4 : i32
    %102 = math.tanh %97 : vector<8x128xf32>
    %cst_42 = arith.constant dense<0.000000e+00> : vector<8x6xf32>
    %103 = tpu.matmul %102, %3, %cst_42 {dimension_numbers = #tpu.dot_dimension_numbers<[1], [0], [0], [1], [0, 0, 1, 1], [], []>} : vector<8x128xf32>, vector<128x6xf32>, vector<8x6xf32> -> vector<8x6xf32>
    %104 = vector.extract_strided_slice %103 {offsets = [0, 0], sizes = [8, 2], strides = [1, 1]} : vector<8x6xf32> to vector<8x2xf32>
    %105 = vector.extract_strided_slice %103 {offsets = [0, 2], sizes = [8, 2], strides = [1, 1]} : vector<8x6xf32> to vector<8x2xf32>
    %106 = vector.extract_strided_slice %103 {offsets = [0, 4], sizes = [8, 2], strides = [1, 1]} : vector<8x6xf32> to vector<8x2xf32>
    %107 = arith.mulf %105, %106 : vector<8x2xf32>
    %108 = tpu.concatenate %104, %107 in 1 : vector<8x2xf32>, vector<8x2xf32> -> vector<8x4xf32>
    %cst_43 = arith.constant dense<0.000000e+00> : vector<8x128xf32>
    %109 = tpu.matmul %108, %4, %cst_43 {dimension_numbers = #tpu.dot_dimension_numbers<[1], [0], [0], [1], [0, 0, 1, 1], [], []>} : vector<8x4xf32>, vector<4x128xf32>, vector<8x128xf32> -> vector<8x128xf32>
    %110 = arith.index_cast %c4_i32 : i32 to index
    %c0_44 = arith.constant 0 : index
    %c0_45 = arith.constant 0 : index
    %111 = vector.load %arg1[%110, %c0_44, %c0_45] : memref<8x8x128xf32, #tpu.memory_space<vmem>>, vector<1x8x128xf32>
    %112 = vector.shape_cast %111 : vector<1x8x128xf32> to vector<8x128xf32>
    %113 = arith.addf %109, %112 : vector<8x128xf32>
    %114 = arith.index_cast %c4_i32 : i32 to index
    %c0_46 = arith.constant 0 : index
    %c0_47 = arith.constant 0 : index
    %115 = vector.load %arg2[%114, %c0_46, %c0_47] : memref<8x8x128xf32, #tpu.memory_space<vmem>>, vector<1x8x128xf32>
    %116 = vector.shape_cast %115 : vector<1x8x128xf32> to vector<8x128xf32>
    %117 = arith.addf %97, %116 : vector<8x128xf32>
    %118 = arith.subf %113, %97 : vector<8x128xf32>
    %cst_48 = arith.constant 2.000000e-01 : f32
    %119 = vector.broadcast %cst_48 : f32 to vector<8x128xf32>
    %120 = arith.mulf %119, %118 : vector<8x128xf32>
    %121 = arith.addf %117, %120 : vector<8x128xf32>
    %122 = arith.index_cast %c4_i32 : i32 to index
    %c0_49 = arith.constant 0 : index
    %c0_50 = arith.constant 0 : index
    %123 = vector.load %arg6[%122, %c0_49, %c0_50] : memref<8x8x128xf32, #tpu.memory_space<vmem>>, vector<1x8x128xf32>
    %124 = vector.shape_cast %123 : vector<1x8x128xf32> to vector<8x128xf32>
    %125 = vector.shape_cast %121 : vector<8x128xf32> to vector<1x8x128xf32>
    tpu.vector_store %arg6[%122, %c0_49, %c0_50], %125 {strides = array<i32>} : memref<8x8x128xf32, #tpu.memory_space<vmem>>, vector<1x8x128xf32>,
    %c5_i32 = arith.constant 5 : i32
    %126 = math.tanh %121 : vector<8x128xf32>
    %cst_51 = arith.constant dense<0.000000e+00> : vector<8x6xf32>
    %127 = tpu.matmul %126, %3, %cst_51 {dimension_numbers = #tpu.dot_dimension_numbers<[1], [0], [0], [1], [0, 0, 1, 1], [], []>} : vector<8x128xf32>, vector<128x6xf32>, vector<8x6xf32> -> vector<8x6xf32>
    %128 = vector.extract_strided_slice %127 {offsets = [0, 0], sizes = [8, 2], strides = [1, 1]} : vector<8x6xf32> to vector<8x2xf32>
    %129 = vector.extract_strided_slice %127 {offsets = [0, 2], sizes = [8, 2], strides = [1, 1]} : vector<8x6xf32> to vector<8x2xf32>
    %130 = vector.extract_strided_slice %127 {offsets = [0, 4], sizes = [8, 2], strides = [1, 1]} : vector<8x6xf32> to vector<8x2xf32>
    %131 = arith.mulf %129, %130 : vector<8x2xf32>
    %132 = tpu.concatenate %128, %131 in 1 : vector<8x2xf32>, vector<8x2xf32> -> vector<8x4xf32>
    %cst_52 = arith.constant dense<0.000000e+00> : vector<8x128xf32>
    %133 = tpu.matmul %132, %4, %cst_52 {dimension_numbers = #tpu.dot_dimension_numbers<[1], [0], [0], [1], [0, 0, 1, 1], [], []>} : vector<8x4xf32>, vector<4x128xf32>, vector<8x128xf32> -> vector<8x128xf32>
    %134 = arith.index_cast %c5_i32 : i32 to index
    %c0_53 = arith.constant 0 : index
    %c0_54 = arith.constant 0 : index
    %135 = vector.load %arg1[%134, %c0_53, %c0_54] : memref<8x8x128xf32, #tpu.memory_space<vmem>>, vector<1x8x128xf32>
    %136 = vector.shape_cast %135 : vector<1x8x128xf32> to vector<8x128xf32>
    %137 = arith.addf %133, %136 : vector<8x128xf32>
    %138 = arith.index_cast %c5_i32 : i32 to index
    %c0_55 = arith.constant 0 : index
    %c0_56 = arith.constant 0 : index
    %139 = vector.load %arg2[%138, %c0_55, %c0_56] : memref<8x8x128xf32, #tpu.memory_space<vmem>>, vector<1x8x128xf32>
    %140 = vector.shape_cast %139 : vector<1x8x128xf32> to vector<8x128xf32>
    %141 = arith.addf %121, %140 : vector<8x128xf32>
    %142 = arith.subf %137, %121 : vector<8x128xf32>
    %cst_57 = arith.constant 2.000000e-01 : f32
    %143 = vector.broadcast %cst_57 : f32 to vector<8x128xf32>
    %144 = arith.mulf %143, %142 : vector<8x128xf32>
    %145 = arith.addf %141, %144 : vector<8x128xf32>
    %146 = arith.index_cast %c5_i32 : i32 to index
    %c0_58 = arith.constant 0 : index
    %c0_59 = arith.constant 0 : index
    %147 = vector.load %arg6[%146, %c0_58, %c0_59] : memref<8x8x128xf32, #tpu.memory_space<vmem>>, vector<1x8x128xf32>
    %148 = vector.shape_cast %147 : vector<1x8x128xf32> to vector<8x128xf32>
    %149 = vector.shape_cast %145 : vector<8x128xf32> to vector<1x8x128xf32>
    tpu.vector_store %arg6[%146, %c0_58, %c0_59], %149 {strides = array<i32>} : memref<8x8x128xf32, #tpu.memory_space<vmem>>, vector<1x8x128xf32>,
    %c6_i32 = arith.constant 6 : i32
    %150 = math.tanh %145 : vector<8x128xf32>
    %cst_60 = arith.constant dense<0.000000e+00> : vector<8x6xf32>
    %151 = tpu.matmul %150, %3, %cst_60 {dimension_numbers = #tpu.dot_dimension_numbers<[1], [0], [0], [1], [0, 0, 1, 1], [], []>} : vector<8x128xf32>, vector<128x6xf32>, vector<8x6xf32> -> vector<8x6xf32>
    %152 = vector.extract_strided_slice %151 {offsets = [0, 0], sizes = [8, 2], strides = [1, 1]} : vector<8x6xf32> to vector<8x2xf32>
    %153 = vector.extract_strided_slice %151 {offsets = [0, 2], sizes = [8, 2], strides = [1, 1]} : vector<8x6xf32> to vector<8x2xf32>
    %154 = vector.extract_strided_slice %151 {offsets = [0, 4], sizes = [8, 2], strides = [1, 1]} : vector<8x6xf32> to vector<8x2xf32>
    %155 = arith.mulf %153, %154 : vector<8x2xf32>
    %156 = tpu.concatenate %152, %155 in 1 : vector<8x2xf32>, vector<8x2xf32> -> vector<8x4xf32>
    %cst_61 = arith.constant dense<0.000000e+00> : vector<8x128xf32>
    %157 = tpu.matmul %156, %4, %cst_61 {dimension_numbers = #tpu.dot_dimension_numbers<[1], [0], [0], [1], [0, 0, 1, 1], [], []>} : vector<8x4xf32>, vector<4x128xf32>, vector<8x128xf32> -> vector<8x128xf32>
    %158 = arith.index_cast %c6_i32 : i32 to index
    %c0_62 = arith.constant 0 : index
    %c0_63 = arith.constant 0 : index
    %159 = vector.load %arg1[%158, %c0_62, %c0_63] : memref<8x8x128xf32, #tpu.memory_space<vmem>>, vector<1x8x128xf32>
    %160 = vector.shape_cast %159 : vector<1x8x128xf32> to vector<8x128xf32>
    %161 = arith.addf %157, %160 : vector<8x128xf32>
    %162 = arith.index_cast %c6_i32 : i32 to index
    %c0_64 = arith.constant 0 : index
    %c0_65 = arith.constant 0 : index
    %163 = vector.load %arg2[%162, %c0_64, %c0_65] : memref<8x8x128xf32, #tpu.memory_space<vmem>>, vector<1x8x128xf32>
    %164 = vector.shape_cast %163 : vector<1x8x128xf32> to vector<8x128xf32>
    %165 = arith.addf %145, %164 : vector<8x128xf32>
    %166 = arith.subf %161, %145 : vector<8x128xf32>
    %cst_66 = arith.constant 2.000000e-01 : f32
    %167 = vector.broadcast %cst_66 : f32 to vector<8x128xf32>
    %168 = arith.mulf %167, %166 : vector<8x128xf32>
    %169 = arith.addf %165, %168 : vector<8x128xf32>
    %170 = arith.index_cast %c6_i32 : i32 to index
    %c0_67 = arith.constant 0 : index
    %c0_68 = arith.constant 0 : index
    %171 = vector.load %arg6[%170, %c0_67, %c0_68] : memref<8x8x128xf32, #tpu.memory_space<vmem>>, vector<1x8x128xf32>
    %172 = vector.shape_cast %171 : vector<1x8x128xf32> to vector<8x128xf32>
    %173 = vector.shape_cast %169 : vector<8x128xf32> to vector<1x8x128xf32>
    tpu.vector_store %arg6[%170, %c0_67, %c0_68], %173 {strides = array<i32>} : memref<8x8x128xf32, #tpu.memory_space<vmem>>, vector<1x8x128xf32>,
    %c7_i32 = arith.constant 7 : i32
    %174 = math.tanh %169 : vector<8x128xf32>
    %cst_69 = arith.constant dense<0.000000e+00> : vector<8x6xf32>
    %175 = tpu.matmul %174, %3, %cst_69 {dimension_numbers = #tpu.dot_dimension_numbers<[1], [0], [0], [1], [0, 0, 1, 1], [], []>} : vector<8x128xf32>, vector<128x6xf32>, vector<8x6xf32> -> vector<8x6xf32>
    %176 = vector.extract_strided_slice %175 {offsets = [0, 0], sizes = [8, 2], strides = [1, 1]} : vector<8x6xf32> to vector<8x2xf32>
    %177 = vector.extract_strided_slice %175 {offsets = [0, 2], sizes = [8, 2], strides = [1, 1]} : vector<8x6xf32> to vector<8x2xf32>
    %178 = vector.extract_strided_slice %175 {offsets = [0, 4], sizes = [8, 2], strides = [1, 1]} : vector<8x6xf32> to vector<8x2xf32>
    %179 = arith.mulf %177, %178 : vector<8x2xf32>
    %180 = tpu.concatenate %176, %179 in 1 : vector<8x2xf32>, vector<8x2xf32> -> vector<8x4xf32>
    %cst_70 = arith.constant dense<0.000000e+00> : vector<8x128xf32>
    %181 = tpu.matmul %180, %4, %cst_70 {dimension_numbers = #tpu.dot_dimension_numbers<[1], [0], [0], [1], [0, 0, 1, 1], [], []>} : vector<8x4xf32>, vector<4x128xf32>, vector<8x128xf32> -> vector<8x128xf32>
    %182 = arith.index_cast %c7_i32 : i32 to index
    %c0_71 = arith.constant 0 : index
    %c0_72 = arith.constant 0 : index
    %183 = vector.load %arg1[%182, %c0_71, %c0_72] : memref<8x8x128xf32, #tpu.memory_space<vmem>>, vector<1x8x128xf32>
    %184 = vector.shape_cast %183 : vector<1x8x128xf32> to vector<8x128xf32>
    %185 = arith.addf %181, %184 : vector<8x128xf32>
    %186 = arith.index_cast %c7_i32 : i32 to index
    %c0_73 = arith.constant 0 : index
    %c0_74 = arith.constant 0 : index
    %187 = vector.load %arg2[%186, %c0_73, %c0_74] : memref<8x8x128xf32, #tpu.memory_space<vmem>>, vector<1x8x128xf32>
    %188 = vector.shape_cast %187 : vector<1x8x128xf32> to vector<8x128xf32>
    %189 = arith.addf %169, %188 : vector<8x128xf32>
    %190 = arith.subf %185, %169 : vector<8x128xf32>
    %cst_75 = arith.constant 2.000000e-01 : f32
    %191 = vector.broadcast %cst_75 : f32 to vector<8x128xf32>
    %192 = arith.mulf %191, %190 : vector<8x128xf32>
    %193 = arith.addf %189, %192 : vector<8x128xf32>
    %194 = arith.index_cast %c7_i32 : i32 to index
    %c0_76 = arith.constant 0 : index
    %c0_77 = arith.constant 0 : index
    %195 = vector.load %arg6[%194, %c0_76, %c0_77] : memref<8x8x128xf32, #tpu.memory_space<vmem>>, vector<1x8x128xf32>
    %196 = vector.shape_cast %195 : vector<1x8x128xf32> to vector<8x128xf32>
    %197 = vector.shape_cast %193 : vector<8x128xf32> to vector<1x8x128xf32>
    tpu.vector_store %arg6[%194, %c0_76, %c0_77], %197 {strides = array<i32>} : memref<8x8x128xf32, #tpu.memory_space<vmem>>, vector<1x8x128xf32>,
    %c8_i32 = arith.constant 8 : i32
    %c0_78 = arith.constant 0 : index
    %c0_79 = arith.constant 0 : index
    %198 = vector.load %arg7[%c0_78, %c0_79] : memref<8x128xf32, #tpu.memory_space<vmem>>, vector<8x128xf32>
    tpu.vector_store %arg7[%c0_78, %c0_79], %193 {strides = array<i32>} : memref<8x128xf32, #tpu.memory_space<vmem>>, vector<8x128xf32>,
    return
  }
  func.func @transform_0(%arg0: i32) -> (i32, i32, i32) {
    %c0_i32 = arith.constant 0 : i32
    %c0_i32_0 = arith.constant 0 : i32
    %c0_i32_1 = arith.constant 0 : i32
    return %arg0, %c0_i32, %c0_i32_0 : i32, i32, i32
  }
  func.func @transform_1(%arg0: i32) -> (i32, i32, i32) {
    %c0_i32 = arith.constant 0 : i32
    %c0_i32_0 = arith.constant 0 : i32
    %c0_i32_1 = arith.constant 0 : i32
    return %arg0, %c0_i32, %c0_i32_0 : i32, i32, i32
  }
  func.func @transform_2(%arg0: i32) -> (i32, i32) {
    %c0_i32 = arith.constant 0 : i32
    %c0_i32_0 = arith.constant 0 : i32
    %c0_i32_1 = arith.constant 0 : i32
    return %c0_i32, %c0_i32_0 : i32, i32
  }
  func.func @transform_3(%arg0: i32) -> (i32, i32) {
    %c0_i32 = arith.constant 0 : i32
    %c0_i32_0 = arith.constant 0 : i32
    %c0_i32_1 = arith.constant 0 : i32
    return %c0_i32, %c0_i32_0 : i32, i32
  }
  func.func @transform_4(%arg0: i32) -> (i32, i32) {
    %c0_i32 = arith.constant 0 : i32
    %c0_i32_0 = arith.constant 0 : i32
    %c0_i32_1 = arith.constant 0 : i32
    return %c0_i32, %c0_i32_0 : i32, i32
  }
  func.func @transform_5(%arg0: i32) -> (i32, i32, i32) {
    %c0_i32 = arith.constant 0 : i32
    %c0_i32_0 = arith.constant 0 : i32
    %c0_i32_1 = arith.constant 0 : i32
    return %arg0, %c0_i32, %c0_i32_0 : i32, i32, i32
  }
}

</mosaic_0001>

<bundles_post_ra>
// kernel: hornn_forward_pallas.1
= control target key start
LH: loop header
LB: loop body
LE: loop exit
PB: predicated region body
PF: predicated region fallthrough
CT: control target
= control target key end

     0   :  { %s586_s26 = smov 126   ;;  %vm77_vm0 = vcmask 1043456   ;;  %vm70_vm1 = vcmask 15360   ;;  %vm73_vm2 = vcmask 31744   ;;  %s950_s3 = inlined_call_operand.vmem [shape: f32[128,6], index: 3, kind: input, shape index: {}]   ;;  %s951_s2 = inlined_call_operand.vmem [shape: f32[8,128], index: 2, kind: input, shape index: {}]   ;;  %s952_s4 = inlined_call_operand.vmem [shape: f32[4,128], index: 4, kind: input, shape index: {}]   ;;  %s953_s0 = inlined_call_operand.vmem [shape: f32[8,8,128], index: 0, kind: input, shape index: {}]   ;;  %s954_s1 = inlined_call_operand.vmem [shape: f32[8,8,128], index: 1, kind: input, shape index: {}]   ;;  %s955_s5 = inlined_call_operand.vmem [shape: f32[8,8,128], index: 5, kind: output, shape index: {}]  }
   0x1   :  { %v620_v0 = vld [vmem:[%s950_s3 + $0x78] sm:$0xff]  ;;  %v625_v1 = vld [vmem:[%s950_s3 + $0x70] sm:$0xff]  ;;  %v632_v2 = vld [vmem:[%s950_s3 + $0x68] sm:$0xff] }
   0x2   :  { %45 = vmatpush.msra.mxu0 %v620_v0  ;;  %168 = vmatpush.msra.mxu1 %v620_v0  ;;  %v639_v3 = vld [vmem:[%s950_s3 + $0x60] sm:$0xff]  ;;  %v646_v4 = vld [vmem:[%s950_s3 + $0x58] sm:$0xff]  ;;  %v653_v5 = vld [vmem:[%s950_s3 + $0x50] sm:$0xff] }
   0x3   :  { %v660_v6 = vld [vmem:[%s950_s3 + $0x48] sm:$0xff]  ;;  %v667_v7 = vld [vmem:[%s950_s3 + $0x40] sm:$0xff]  ;;  %v674_v8 = vld [vmem:[%s950_s3 + $0x38] sm:$0xff] }
   0x4   :  { %46 = vmatpush.msra.mxu0 %v625_v1  ;;  %169 = vmatpush.msra.mxu1 %v625_v1  ;;  %v681_v9 = vld [vmem:[%s950_s3 + $0x30] sm:$0xff]  ;;  %v688_v10 = vld [vmem:[%s950_s3 + $0x28] sm:$0xff]  ;;  %v695_v11 = vld [vmem:[%s950_s3 + $0x20] sm:$0xff] }
   0x5   :  { %v700_v12 = vld [vmem:[%s951_s2] sm:$0xff]  ;;  %v707_v13 = vld [vmem:[%s950_s3 + $0x18] sm:$0xff]  ;;  %v715_v14 = vld [vmem:[%s950_s3 + $0x10] sm:$0xff] }
   0x6   :  { %47 = vmatpush.msra.mxu0 %v632_v2  ;;  %170 = vmatpush.msra.mxu1 %v632_v2  ;;  %570 = vtanh.f32 %v700_v12  ;;  %v722_v15 = vld [vmem:[%s950_s3 + $0x8] sm:$0xff]  ;;  %v729_v16 = vld [vmem:[%s950_s3] sm:$0xff]  ;;  %v539_v49 = vld [vmem:[%s953_s0 + $0x10] sm:$0xff] }
   0x7   :  { %v739_v19 = vld [vmem:[%s952_s4] sm:$0xf]  ;;  %v534_v36 = vld [vmem:[%s953_s0 + $0x8] sm:$0xff]  ;;  %v542_v52 = vld [vmem:[%s954_s1 + $0x10] sm:$0xff] }
   0x8   :  { %48 = vmatpush.msra.mxu0 %v639_v3  ;;  %171 = vmatpush.msra.mxu1 %v639_v3  ;;  %v72_v23 = vld [vmem:[%s953_s0] sm:$0xff]  ;;  %v537_v39 = vld [vmem:[%s954_s1 + $0x8] sm:$0xff]  ;;  %v544_v62 = vld [vmem:[%s953_s0 + $0x18] sm:$0xff] }
   0x9   :  { %532 = vmatpush.msk.msra.mxu2 %vm77_vm0, %v739_v19  ;;  %535 = vmatpush.msk.msra.mxu3 %vm77_vm0, %v739_v19  ;;  %v101_v25 = vld [vmem:[%s954_s1] sm:$0xff] }
   0xa   :  { %49 = vmatpush.msra.mxu0 %v646_v4  ;;  %172 = vmatpush.msra.mxu1 %v646_v4  ;;  %v102_v27 = vadd.f32 %v101_v25, %v700_v12 }
   0xb   :  { %108 = vmatpush.msrb.mxu2 %v620_v0  ;;  %540 = vmatpush.msk.msrb.mxu3 %vm77_vm0, %v739_v19 }
   0xc   :  { %50 = vmatpush.msra.mxu0 %v653_v5  ;;  %173 = vmatpush.msra.mxu1 %v653_v5  ;;  %v571_v17 = vpop.eup %570 }
   0xd   :  { %109 = vmatpush.msrb.mxu2 %v625_v1 }
   0xe   :  { %51 = vmatpush.msra.mxu0 %v660_v6  ;;  %174 = vmatpush.msra.mxu1 %v660_v6 }
   0xf   :  { %110 = vmatpush.msrb.mxu2 %v632_v2 }
  0x10   :  { %52 = vmatpush.msra.mxu0 %v667_v7  ;;  %175 = vmatpush.msra.mxu1 %v667_v7 }
  0x11   :  { %111 = vmatpush.msrb.mxu2 %v639_v3 }
  0x12   :  { %53 = vmatpush.msra.mxu0 %v674_v8  ;;  %176 = vmatpush.msra.mxu1 %v674_v8 }
  0x13   :  { %112 = vmatpush.msrb.mxu2 %v646_v4 }
  0x14   :  { %54 = vmatpush.msra.mxu0 %v681_v9  ;;  %177 = vmatpush.msra.mxu1 %v681_v9 }
  0x15   :  { %113 = vmatpush.msrb.mxu2 %v653_v5 }
  0x16   :  { %55 = vmatpush.msra.mxu0 %v688_v10  ;;  %178 = vmatpush.msra.mxu1 %v688_v10 }
  0x17   :  { %114 = vmatpush.msrb.mxu2 %v660_v6 }
  0x18   :  { %56 = vmatpush.msra.mxu0 %v695_v11  ;;  %179 = vmatpush.msra.mxu1 %v695_v11 }
  0x19   :  { %115 = vmatpush.msrb.mxu2 %v667_v7 }
  0x1a   :  { %57 = vmatpush.msra.mxu0 %v707_v13  ;;  %180 = vmatpush.msra.mxu1 %v707_v13 }
  0x1b   :  { %116 = vmatpush.msrb.mxu2 %v674_v8 }
  0x1c   :  { %58 = vmatpush.msra.mxu0 %v715_v14  ;;  %181 = vmatpush.msra.mxu1 %v715_v14 }
  0x1d   :  { %117 = vmatpush.msrb.mxu2 %v681_v9 }
  0x1e   :  { %59 = vmatpush.msra.mxu0 %v722_v15  ;;  %182 = vmatpush.msra.mxu1 %v722_v15 }
  0x1f   :  { %118 = vmatpush.msrb.mxu2 %v688_v10 }
  0x20   :  { %60 = vmatpush.msra.mxu0 %v729_v16  ;;  %183 = vmatpush.msra.mxu1 %v729_v16 }
  0x21   :  { %61 = vmatmul.f32.vlgmr.msra.gmra.mxu0 %v571_v17  ;;  %119 = vmatpush.msrb.mxu2 %v695_v11  ;;  %v547_v17 = vld [vmem:[%s954_s1 + $0x18] sm:$0xff] }
  0x22   :  { %545 = vmatpush.msk.msrb.mxu0 %vm77_vm0, %v739_v19  ;;  %555 = vmatpush.msk.msrb.mxu1 %vm77_vm0, %v739_v19 }
  0x23   :  { %120 = vmatpush.msrb.mxu2 %v707_v13 }
  0x24   :  { %550 = vmatpush.msk.msra.mxu0 %vm77_vm0, %v739_v19 }
  0x25   :  { %121 = vmatpush.msrb.mxu2 %v715_v14 }
  0x27   :  { %122 = vmatpush.msrb.mxu2 %v722_v15 }
  0x29   :  { %123 = vmatpush.msrb.mxu2 %v729_v16 }
  0x9e   :  { %v62_v18 = vpop.f32.mrf.mxu0 }
  0x9f   :  { %66 = vrot.lane.b32.xlu0 %v62_v18, %s586_s26 }
 0x111   :  { %v67_v20 = vpop.permute.xlu0 %66 }
 0x112   :  { %v69_v21 = vmul.f32 %v67_v20, %v62_v18 }
 0x114   :  { %v71_v22 = vsel %vm70_vm1, %v62_v18, %v69_v21 }
 0x115   :  { %533 = vmatmul.msk.f32.vlgmr.msra.gmra.mxu2 %vm73_vm2, %v71_v22 }
 0x116   :  { %288 = vmatpush.msra.mxu2 %v620_v0 }
 0x118   :  { %289 = vmatpush.msra.mxu2 %v625_v1 }
 0x11a   :  { %290 = vmatpush.msra.mxu2 %v632_v2 }
 0x11c   :  { %291 = vmatpush.msra.mxu2 %v639_v3 }
 0x11e   :  { %292 = vmatpush.msra.mxu2 %v646_v4 }
 0x120   :  { %293 = vmatpush.msra.mxu2 %v653_v5 }
 0x122   :  { %294 = vmatpush.msra.mxu2 %v660_v6 }
 0x124   :  { %295 = vmatpush.msra.mxu2 %v667_v7 }
 0x126   :  { %296 = vmatpush.msra.mxu2 %v674_v8 }
 0x128   :  { %297 = vmatpush.msra.mxu2 %v681_v9 }
 0x12a   :  { %298 = vmatpush.msra.mxu2 %v688_v10 }
 0x12c   :  { %299 = vmatpush.msra.mxu2 %v695_v11 }
 0x12e   :  { %300 = vmatpush.msra.mxu2 %v707_v13 }
 0x130   :  { %301 = vmatpush.msra.mxu2 %v715_v14 }
 0x132   :  { %302 = vmatpush.msra.mxu2 %v722_v15 }
 0x134   :  { %303 = vmatpush.msra.mxu2 %v729_v16 }
 0x198   :  { %v98_v24 = vpop.f32.mrf.mxu2 }
 0x199   :  { %v99_v26 = vadd.f32 %v98_v24, %v72_v23 }
 0x19b   :  { %v103_v28 = vsub.f32 %v99_v26, %v700_v12 }
 0x19d   :  { %v104_v29 = vmul.f32 0.2, %v103_v28 }
 0x19f   :  { %v105_v30 = vadd.f32 %v104_v29, %v102_v27  ;;  %v549_v27 = vld [vmem:[%s953_s0 + $0x20] sm:$0xff] }
 0x1a1   :  { %106 = vst [vmem:[%s955_s5] sm:$0xff] %v105_v30  ;;  %572 = vtanh.f32 %v105_v30  ;;  %v161_v41 = vadd.f32 %v537_v39, %v105_v30 }
 0x1a7   :  { %v573_v31 = vpop.eup %572 }
 0x1a8   :  { %124 = vmatmul.f32.vlgmr.msrb.gmra.mxu2 %v573_v31 }
 0x1a9   :  { %565 = vmatpush.msk.msrb.mxu2 %vm77_vm0, %v739_v19 }
 0x22b   :  { %v125_v32 = vpop.f32.mrf.mxu2 }
 0x22c   :  { %129 = vrot.lane.b32.xlu0 %v125_v32, %s586_s26 }
 0x29e   :  { %v130_v33 = vpop.permute.xlu0 %129 }
 0x29f   :  { %v132_v34 = vmul.f32 %v130_v33, %v125_v32 }
 0x2a1   :  { %v133_v35 = vsel %vm70_vm1, %v125_v32, %v132_v34 }
 0x2a2   :  { %536 = vmatmul.msk.f32.vlgmr.msra.gmra.mxu3 %vm73_vm2, %v133_v35 }
 0x2a3   :  { %228 = vmatpush.msra.mxu3 %v620_v0 }
 0x2a5   :  { %229 = vmatpush.msra.mxu3 %v625_v1 }
 0x2a7   :  { %230 = vmatpush.msra.mxu3 %v632_v2 }
 0x2a9   :  { %231 = vmatpush.msra.mxu3 %v639_v3 }
 0x2ab   :  { %232 = vmatpush.msra.mxu3 %v646_v4 }
 0x2ad   :  { %233 = vmatpush.msra.mxu3 %v653_v5 }
 0x2af   :  { %234 = vmatpush.msra.mxu3 %v660_v6 }
 0x2b1   :  { %235 = vmatpush.msra.mxu3 %v667_v7 }
 0x2b3   :  { %236 = vmatpush.msra.mxu3 %v674_v8 }
 0x2b5   :  { %237 = vmatpush.msra.mxu3 %v681_v9 }
 0x2b7   :  { %238 = vmatpush.msra.mxu3 %v688_v10 }
 0x2b9   :  { %239 = vmatpush.msra.mxu3 %v695_v11 }
 0x2bb   :  { %240 = vmatpush.msra.mxu3 %v707_v13 }
 0x2bd   :  { %241 = vmatpush.msra.mxu3 %v715_v14 }
 0x2bf   :  { %242 = vmatpush.msra.mxu3 %v722_v15 }
 0x2c1   :  { %243 = vmatpush.msra.mxu3 %v729_v16 }
 0x325   :  { %v156_v37 = vpop.f32.mrf.mxu3 }
 0x326   :  { %v157_v38 = vadd.f32 %v534_v36, %v156_v37 }
 0x328   :  { %v162_v40 = vsub.f32 %v157_v38, %v105_v30  ;;  %v552_v30 = vld [vmem:[%s954_s1 + $0x20] sm:$0xff] }
 0x32a   :  { %v163_v42 = vmul.f32 0.2, %v162_v40  ;;  %v562_v40 = vld [vmem:[%s954_s1 + $0x30] sm:$0xff] }
 0x32c   :  { %v164_v43 = vadd.f32 %v163_v42, %v161_v41 }
 0x32e   :  { %538 = vst [vmem:[%s955_s5 + $0x8] sm:$0xff] %v164_v43  ;;  %574 = vtanh.f32 %v164_v43  ;;  %v221_v54 = vadd.f32 %v542_v52, %v164_v43 }
 0x334   :  { %v575_v44 = vpop.eup %574 }
 0x335   :  { %184 = vmatmul.f32.vlgmr.msra.gmra.mxu1 %v575_v44 }
 0x336   :  { %560 = vmatpush.msk.msra.mxu1 %vm77_vm0, %v739_v19 }
 0x3b2   :  { %v185_v45 = vpop.f32.mrf.mxu1 }
 0x3b3   :  { %189 = vrot.lane.b32.xlu1 %v185_v45, %s586_s26 }
 0x425   :  { %v190_v46 = vpop.permute.xlu1 %189 }
 0x426   :  { %v192_v47 = vmul.f32 %v190_v46, %v185_v45 }
 0x428   :  { %v193_v48 = vsel %vm70_vm1, %v185_v45, %v192_v47 }
 0x429   :  { %541 = vmatmul.msk.f32.vlgmr.msrb.gmra.mxu3 %vm73_vm2, %v193_v48 }
 0x42a   :  { %408 = vmatpush.msrb.mxu3 %v620_v0 }
 0x42c   :  { %409 = vmatpush.msrb.mxu3 %v625_v1 }
 0x42e   :  { %410 = vmatpush.msrb.mxu3 %v632_v2 }
 0x430   :  { %411 = vmatpush.msrb.mxu3 %v639_v3 }
 0x432   :  { %412 = vmatpush.msrb.mxu3 %v646_v4 }
 0x434   :  { %413 = vmatpush.msrb.mxu3 %v653_v5 }
 0x436   :  { %414 = vmatpush.msrb.mxu3 %v660_v6 }
 0x438   :  { %415 = vmatpush.msrb.mxu3 %v667_v7 }
 0x43a   :  { %416 = vmatpush.msrb.mxu3 %v674_v8 }
 0x43c   :  { %417 = vmatpush.msrb.mxu3 %v681_v9 }
 0x43e   :  { %418 = vmatpush.msrb.mxu3 %v688_v10 }
 0x440   :  { %419 = vmatpush.msrb.mxu3 %v695_v11 }
 0x442   :  { %420 = vmatpush.msrb.mxu3 %v707_v13 }
 0x444   :  { %421 = vmatpush.msrb.mxu3 %v715_v14 }
 0x446   :  { %422 = vmatpush.msrb.mxu3 %v722_v15 }
 0x448   :  { %423 = vmatpush.msrb.mxu3 %v729_v16 }
 0x4ac   :  { %v216_v50 = vpop.f32.mrf.mxu3 }
 0x4ad   :  { %v217_v51 = vadd.f32 %v539_v49, %v216_v50  ;;  %v564_v50 = vld [vmem:[%s953_s0 + $0x38] sm:$0xff] }
 0x4af   :  { %v222_v53 = vsub.f32 %v217_v51, %v164_v43 }
 0x4b1   :  { %v223_v55 = vmul.f32 0.2, %v222_v53  ;;  %v567_v53 = vld [vmem:[%s954_s1 + $0x38] sm:$0xff] }
 0x4b3   :  { %v224_v56 = vadd.f32 %v223_v55, %v221_v54 }
 0x4b5   :  { %543 = vst [vmem:[%s955_s5 + $0x10] sm:$0xff] %v224_v56  ;;  %576 = vtanh.f32 %v224_v56  ;;  %v281_v19 = vadd.f32 %v547_v17, %v224_v56 }
 0x4bb   :  { %v577_v57 = vpop.eup %576 }
 0x4bc   :  { %244 = vmatmul.f32.vlgmr.msra.gmra.mxu3 %v577_v57 }
 0x53f   :  { %v245_v58 = vpop.f32.mrf.mxu3 }
 0x540   :  { %249 = vrot.lane.b32.xlu1 %v245_v58, %s586_s26 }
 0x5b2   :  { %v250_v59 = vpop.permute.xlu1 %249 }
 0x5b3   :  { %v252_v60 = vmul.f32 %v250_v59, %v245_v58 }
 0x5b5   :  { %v253_v61 = vsel %vm70_vm1, %v245_v58, %v252_v60 }
 0x5b6   :  { %546 = vmatmul.msk.f32.vlgmr.msrb.gmra.mxu0 %vm73_vm2, %v253_v61 }
 0x5b7   :  { %348 = vmatpush.msrb.mxu0 %v620_v0 }
 0x5b9   :  { %349 = vmatpush.msrb.mxu0 %v625_v1 }
 0x5bb   :  { %350 = vmatpush.msrb.mxu0 %v632_v2 }
 0x5bd   :  { %351 = vmatpush.msrb.mxu0 %v639_v3 }
 0x5bf   :  { %352 = vmatpush.msrb.mxu0 %v646_v4 }
 0x5c1   :  { %353 = vmatpush.msrb.mxu0 %v653_v5 }
 0x5c3   :  { %354 = vmatpush.msrb.mxu0 %v660_v6 }
 0x5c5   :  { %355 = vmatpush.msrb.mxu0 %v667_v7 }
 0x5c7   :  { %356 = vmatpush.msrb.mxu0 %v674_v8 }
 0x5c9   :  { %357 = vmatpush.msrb.mxu0 %v681_v9 }
 0x5cb   :  { %358 = vmatpush.msrb.mxu0 %v688_v10 }
 0x5cd   :  { %359 = vmatpush.msrb.mxu0 %v695_v11 }
 0x5cf   :  { %360 = vmatpush.msrb.mxu0 %v707_v13 }
 0x5d1   :  { %361 = vmatpush.msrb.mxu0 %v715_v14 }
 0x5d3   :  { %362 = vmatpush.msrb.mxu0 %v722_v15 }
 0x5d5   :  { %363 = vmatpush.msrb.mxu0 %v729_v16 }
 0x633   :  { %v276_v63 = vpop.f32.mrf.mxu0 }
 0x634   :  { %v277_v12 = vadd.f32 %v544_v62, %v276_v63 }
 0x636   :  { %v282_v18 = vsub.f32 %v277_v12, %v224_v56 }
 0x638   :  { %v283_v20 = vmul.f32 0.2, %v282_v18 }
 0x63a   :  { %v284_v21 = vadd.f32 %v283_v20, %v281_v19 }
 0x63c   :  { %548 = vst [vmem:[%s955_s5 + $0x18] sm:$0xff] %v284_v21  ;;  %578 = vtanh.f32 %v284_v21  ;;  %v341_v32 = vadd.f32 %v552_v30, %v284_v21 }
 0x642   :  { %v579_v22 = vpop.eup %578 }
 0x643   :  { %304 = vmatmul.f32.vlgmr.msra.gmra.mxu2 %v579_v22 }
 0x6c6   :  { %v305_v23 = vpop.f32.mrf.mxu2 }
 0x6c7   :  { %309 = vrot.lane.b32.xlu2 %v305_v23, %s586_s26 }
 0x721   :  { %v310_v24 = vpop.permute.xlu2 %309 }
 0x722   :  { %v312_v25 = vmul.f32 %v310_v24, %v305_v23 }
 0x724   :  { %v313_v26 = vsel %vm70_vm1, %v305_v23, %v312_v25 }
 0x725   :  { %551 = vmatmul.msk.f32.vlgmr.msra.gmra.mxu0 %vm73_vm2, %v313_v26 }
 0x7a2   :  { %v336_v28 = vpop.f32.mrf.mxu0 }
 0x7a3   :  { %v337_v29 = vadd.f32 %v549_v27, %v336_v28 }
 0x7a5   :  { %v342_v31 = vsub.f32 %v337_v29, %v284_v21 }
 0x7a7   :  { %v343_v33 = vmul.f32 0.2, %v342_v31 }
 0x7a9   :  { %v344_v34 = vadd.f32 %v343_v33, %v341_v32 }
 0x7ab   :  { %553 = vst [vmem:[%s955_s5 + $0x20] sm:$0xff] %v344_v34  ;;  %580 = vtanh.f32 %v344_v34 }
 0x7b1   :  { %v581_v35 = vpop.eup %580 }
 0x7b2   :  { %364 = vmatmul.f32.vlgmr.msrb.gmra.mxu0 %v581_v35 }
 0x82f   :  { %v365_v36 = vpop.f32.mrf.mxu0 }
 0x830   :  { %369 = vrot.lane.b32.xlu2 %v365_v36, %s586_s26 }
 0x88a   :  { %v370_v37 = vpop.permute.xlu2 %369 }
 0x88b   :  { %v372_v38 = vmul.f32 %v370_v37, %v365_v36 }
 0x88d   :  { %v373_v39 = vsel %vm70_vm1, %v365_v36, %v372_v38 }
 0x88e   :  { %556 = vmatmul.msk.f32.vlgmr.msrb.gmra.mxu1 %vm73_vm2, %v373_v39 }
 0x88f   :  { %468 = vmatpush.msrb.mxu1 %v620_v0  ;;  %v554_v0 = vld [vmem:[%s953_s0 + $0x28] sm:$0xff] }
 0x891   :  { %469 = vmatpush.msrb.mxu1 %v625_v1 }
 0x893   :  { %470 = vmatpush.msrb.mxu1 %v632_v2 }
 0x895   :  { %471 = vmatpush.msrb.mxu1 %v639_v3  ;;  %v557_v3 = vld [vmem:[%s954_s1 + $0x28] sm:$0xff] }
 0x897   :  { %472 = vmatpush.msrb.mxu1 %v646_v4 }
 0x899   :  { %473 = vmatpush.msrb.mxu1 %v653_v5  ;;  %v401_v5 = vadd.f32 %v557_v3, %v344_v34 }
 0x89b   :  { %474 = vmatpush.msrb.mxu1 %v660_v6 }
 0x89d   :  { %475 = vmatpush.msrb.mxu1 %v667_v7 }
 0x89f   :  { %476 = vmatpush.msrb.mxu1 %v674_v8 }
 0x8a1   :  { %477 = vmatpush.msrb.mxu1 %v681_v9 }
 0x8a3   :  { %478 = vmatpush.msrb.mxu1 %v688_v10 }
 0x8a5   :  { %479 = vmatpush.msrb.mxu1 %v695_v11 }
 0x8a7   :  { %480 = vmatpush.msrb.mxu1 %v707_v13 }
 0x8a9   :  { %481 = vmatpush.msrb.mxu1 %v715_v14  ;;  %v559_v14 = vld [vmem:[%s953_s0 + $0x30] sm:$0xff] }
 0x8ab   :  { %482 = vmatpush.msrb.mxu1 %v722_v15 }
 0x8ad   :  { %483 = vmatpush.msrb.mxu1 %v729_v16 }
 0x90b   :  { %v396_v1 = vpop.f32.mrf.mxu1 }
 0x90c   :  { %v397_v2 = vadd.f32 %v554_v0, %v396_v1 }
 0x90e   :  { %v402_v4 = vsub.f32 %v397_v2, %v344_v34 }
 0x910   :  { %v403_v6 = vmul.f32 0.2, %v402_v4 }
 0x912   :  { %v404_v7 = vadd.f32 %v403_v6, %v401_v5 }
 0x914   :  { %558 = vst [vmem:[%s955_s5 + $0x28] sm:$0xff] %v404_v7  ;;  %582 = vtanh.f32 %v404_v7  ;;  %v461_v42 = vadd.f32 %v562_v40, %v404_v7 }
 0x91a   :  { %v583_v8 = vpop.eup %582 }
 0x91b   :  { %424 = vmatmul.f32.vlgmr.msrb.gmra.mxu3 %v583_v8 }
 0x99e   :  { %v425_v9 = vpop.f32.mrf.mxu3 }
 0x99f   :  { %429 = vrot.lane.b32.xlu0 %v425_v9, %s586_s26 }
 0xa11   :  { %v430_v10 = vpop.permute.xlu0 %429 }
 0xa12   :  { %v432_v11 = vmul.f32 %v430_v10, %v425_v9 }
 0xa14   :  { %v433_v13 = vsel %vm70_vm1, %v425_v9, %v432_v11 }
 0xa15   :  { %561 = vmatmul.msk.f32.vlgmr.msra.gmra.mxu1 %vm73_vm2, %v433_v13 }
 0xa92   :  { %v456_v15 = vpop.f32.mrf.mxu1 }
 0xa93   :  { %v457_v16 = vadd.f32 %v559_v14, %v456_v15 }
 0xa95   :  { %v462_v41 = vsub.f32 %v457_v16, %v404_v7 }
 0xa97   :  { %v463_v43 = vmul.f32 0.2, %v462_v41 }
 0xa99   :  { %v464_v44 = vadd.f32 %v463_v43, %v461_v42 }
 0xa9b   :  { %563 = vst [vmem:[%s955_s5 + $0x30] sm:$0xff] %v464_v44  ;;  %584 = vtanh.f32 %v464_v44  ;;  %v521_v55 = vadd.f32 %v567_v53, %v464_v44 }
 0xaa1   :  { %v585_v45 = vpop.eup %584 }
 0xaa2   :  { %484 = vmatmul.f32.vlgmr.msrb.gmra.mxu1 %v585_v45 }
 0xb1f   :  { %v485_v46 = vpop.f32.mrf.mxu1 }
 0xb20   :  { %489 = vrot.lane.b32.xlu1 %v485_v46, %s586_s26 }
 0xb92   :  { %v490_v47 = vpop.permute.xlu1 %489 }
 0xb93   :  { %v492_v48 = vmul.f32 %v490_v47, %v485_v46 }
 0xb95   :  { %v493_v49 = vsel %vm70_vm1, %v485_v46, %v492_v48 }
 0xb96   :  { %566 = vmatmul.msk.f32.vlgmr.msrb.gmra.mxu2 %vm73_vm2, %v493_v49 }
 0xc19   :  { %v516_v51 = vpop.f32.mrf.mxu2 }
 0xc1a   :  { %v517_v52 = vadd.f32 %v564_v50, %v516_v51 }
 0xc1c   :  { %v522_v54 = vsub.f32 %v517_v52, %v464_v44 }
 0xc1e   :  { %v523_v56 = vmul.f32 0.2, %v522_v54 }
 0xc20   :  { %v524_v57 = vadd.f32 %v523_v56, %v521_v55 }
 0xc22   :  { %568 = vst [vmem:[%s955_s5 + $0x38] sm:$0xff] %v524_v57 }

</bundles_post_ra>
